<compile_context>
chip_gen: v6e
topology: v6e:2x2x1
jax: 0.10.0
libtpu: 0.0.40
codegen_flags: <defaults>
</compile_context>

<pallas_src>
import math
import functools

import jax
import jax.numpy as jnp
from jax.experimental import pallas as pl
from jax.experimental.pallas import tpu as pltpu


# ----------------------------------------------------------------------------
# Hardware / tiling helpers
# ----------------------------------------------------------------------------
def _vmem_capacity_bytes():
    try:
        return int(pltpu.get_tpu_info().vmem_capacity_bytes)
    except Exception:
        return 64 * 1024 * 1024  # conservative (v7x per-TensorCore VMEM)


def _round_up(x, m):
    return ((x + m - 1) // m) * m


def _tile_for(dim, cap, align):
    """Return (tile, padded_dim).

    If dim fits under the cap, a single full-dim block is used (always legal).
    Otherwise pick the largest aligned divisor <= cap; if none exists, pad the
    dimension up to a multiple of the aligned cap so pipelining is preserved.
    """
    cap = max(align, (cap // align) * align)
    if dim <= cap:
        return dim, dim
    t = cap
    while t >= align:
        if dim % t == 0:
            return t, dim
        t -= align
    return cap, _round_up(dim, cap)


# ----------------------------------------------------------------------------
# Kernel 1: tiled stacked GEMM   out[s] = x @ w[s] + b[s]
#   x: (M, K), w: (S, K, N) (pre-transposed torch weights), b: (S, N)
#   Used for the fused QKV projection (S=3, writes the (3, B*T, E) layout the
#   attention kernel consumes directly) and the out-projection (S=1).
# ----------------------------------------------------------------------------
def _matmul_bias_kernel(x_ref, w_ref, b_ref, o_ref, acc_ref):
    @pl.when(pl.program_id(3) == 0)
    def _init():
        acc_ref[...] = jnp.zeros_like(acc_ref)

    acc_ref[...] += jnp.dot(x_ref[...], w_ref[0],
                            preferred_element_type=jnp.float32)

    @pl.when(pl.program_id(3) == pl.num_programs(3) - 1)
    def _finalize():
        o_ref[0] = (acc_ref[...] + b_ref[0]).astype(o_ref.dtype)


def matmul_bias(x, w, b, out_dtype, tm_cap=512, tn_cap=512, tk_cap=1024):
    """x: (M, K); w: (S, K, N); b: (S, N) -> (S, M, N)."""
    m, k = x.shape
    s, k2, n = w.shape
    assert k2 == k and b.shape == (s, n)

    tm, mp = _tile_for(m, tm_cap, 16)     # bf16 sublane packing wants 16
    tk, kp = _tile_for(k, tk_cap, 128)
    tn, np_ = _tile_for(n, tn_cap, 128)

    if (mp, kp) != (m, k):
        x = jnp.pad(x, ((0, mp - m), (0, kp - k)))
    if (kp, np_) != (k, n):
        w = jnp.pad(w, ((0, 0), (0, kp - k), (0, np_ - n)))
    if np_ != n:
        b = jnp.pad(b, ((0, 0), (0, np_ - n)))
    b = b.reshape(s, 1, np_)

    est = (2 * tm * tk * 2 + 2 * tk * tn * 2          # double-buffered x / w
           + tm * tn * 4                              # f32 accumulator
           + 2 * tm * tn * jnp.dtype(out_dtype).itemsize
           + 2 * tn * 4)                              # bias
    vmem_limit = int(min(0.85 * _vmem_capacity_bytes(),
                         max(32 * 1024 * 1024, 4 * est)))

    out = pl.pallas_call(
        _matmul_bias_kernel,
        out_shape=jax.ShapeDtypeStruct((s, mp, np_), out_dtype),
        grid_spec=pltpu.PrefetchScalarGridSpec(
            num_scalar_prefetch=0,
            grid=(s, mp // tm, np_ // tn, kp // tk),
            in_specs=[
                pl.BlockSpec((tm, tk), lambda si, i, j, kk: (i, kk)),
                pl.BlockSpec((1, tk, tn), lambda si, i, j, kk: (si, kk, j)),
                pl.BlockSpec((1, 1, tn), lambda si, i, j, kk: (si, 0, j)),
            ],
            out_specs=pl.BlockSpec((1, tm, tn), lambda si, i, j, kk: (si, i, j)),
            scratch_shapes=[pltpu.VMEM((tm, tn), jnp.float32)],
        ),
        compiler_params=pltpu.CompilerParams(
            dimension_semantics=("parallel", "parallel", "parallel", "arbitrary"),
            vmem_limit_bytes=vmem_limit),
    )(x, w, b)

    if (mp, np_) != (m, n):
        out = out[:, :m, :n]
    return out


# ----------------------------------------------------------------------------
# Kernel 2: attention core.
#   grid = (B, T/Tq, H/g); per step:
#     q block (1, Tq, g*hd), k/v blocks (1, T, g*hd) read straight from the
#     (3, B*T, E) QKV output; per-head softmax; ctx written as a lane-dense
#     (Tq, g*hd) block of the (B*T, E) output; head-averaged weights
#     accumulated into a resident (1, Tq, T) f32 block across the hg axis.
# ----------------------------------------------------------------------------
def _attn_kernel(q_ref, k_ref, v_ref, ctx_ref, wmean_ref, *, g, hd, inv_heads):
    hg = pl.program_id(2)

    q = q_ref[0]          # (Tq, g*hd) bf16, scaling already folded into Wq/bq
    k = k_ref[0]          # (S,  g*hd) bf16
    v = v_ref[0]          # (S,  g*hd) bf16

    ctx_parts = []
    w_sum = None
    for hh in range(g):                       # static unroll over the head group
        lo = hh * hd
        qh = q[:, lo:lo + hd]                 # (Tq, hd)
        kh = k[:, lo:lo + hd]                 # (S,  hd)
        vh = v[:, lo:lo + hd]                 # (S,  hd)

        scores = jnp.einsum("td,sd->ts", qh, kh,
                            preferred_element_type=jnp.float32)   # (Tq, S) f32
        m = jnp.max(scores, axis=-1, keepdims=True)
        p = jnp.exp(scores - m)
        denom = jnp.sum(p, axis=-1, keepdims=True)
        w = p * pl.reciprocal(denom, approx=True)                 # (Tq, S) f32

        ctx_parts.append(
            jnp.dot(w.astype(vh.dtype), vh,
                    preferred_element_type=jnp.float32).astype(ctx_ref.dtype))
        w_sum = w if w_sum is None else w_sum + w

    # Single lane-dense store: (Tq, g*hd) block -> dense HBM writeback.
    ctx_ref[...] = jnp.concatenate(ctx_parts, axis=-1)

    # Head-averaged softmax weights, accumulated across head-group steps.
    @pl.when(hg == 0)
    def _init():
        wmean_ref[...] = jnp.zeros_like(wmean_ref)

    wmean_ref[0] += w_sum * inv_heads


def _attn_vmem_bytes(tq, t, g, hd):
    ghd = g * hd
    inp = 2 * tq * ghd * 2 + 2 * 2 * t * ghd * 2      # double-buffered bf16 q/k/v
    out = 2 * tq * ghd * 2 + 2 * tq * t * 4           # ctx + wmean blocks
    tmp = 6 * tq * t * 4 + 2 * tq * ghd * 4           # f32 score/softmax temps
    return inp + out + tmp


def _choose_attn_tiles(seq, num_heads, head_dim, budget):
    """Pick (heads_per_step g, query tile Tq) that fit the VMEM budget with
    block shapes legal under the (8, 128) tiling rules."""
    gs = [g for g in range(num_heads, 0, -1)
          if num_heads % g == 0
          and ((g * head_dim) % 128 == 0 or g == num_heads)]
    tq_cap = min(seq, 256)
    tqs = [tq for tq in range(tq_cap, 0, -1)
           if seq % tq == 0 and (tq % 8 == 0 or tq == seq)]
    if not tqs:
        tqs = [seq]
    for tq in tqs:            # prefer larger Tq (cuts K/V HBM re-reads)
        for g in gs:          # then larger head groups (fewer grid steps)
            if _attn_vmem_bytes(tq, seq, g, head_dim) <= budget:
                return g, tq
    return gs[-1], tqs[-1]


def attention_core(qkv3, num_heads, bsz, seq):
    """qkv3: (3, B*T, E) bf16, rows batch-major (row = b*T + t), q pre-scaled.

    Returns ctx (B*T, E) bf16 and head-averaged softmax weights (B, T, T) f32.
    """
    three, bt, e = qkv3.shape
    assert three == 3 and bt == bsz * seq
    h = num_heads
    hd = e // h
    # TODO(synk): pad T to a multiple of 8 (with masking) for ragged batch>1.
    assert seq % 8 == 0 or bsz == 1

    cap = _vmem_capacity_bytes()
    g, tq = _choose_attn_tiles(seq, h, hd, budget=int(0.45 * cap))
    ghd = g * hd
    n_hg = h // g
    n_tq = seq // tq
    est = _attn_vmem_bytes(tq, seq, g, hd)
    vmem_limit = int(min(0.85 * cap, max(32 * 1024 * 1024, 2 * est)))

    kernel = functools.partial(_attn_kernel, g=g, hd=hd, inv_heads=1.0 / h)
    return pl.pallas_call(
        kernel,
        out_shape=(
            jax.ShapeDtypeStruct((bt, e), qkv3.dtype),
            jax.ShapeDtypeStruct((bsz, seq, seq), jnp.float32),
        ),
        grid=(bsz, n_tq, n_hg),
        in_specs=[
            # q: (1, Tq, g*hd) column block of the q slab, row block b*T + qi*Tq
            pl.BlockSpec((1, tq, ghd), lambda bi, qi, hg: (0, bi * n_tq + qi, hg)),
            # k/v: full-sequence (1, T, g*hd) column blocks of their slabs
            pl.BlockSpec((1, seq, ghd), lambda bi, qi, hg: (1, bi, hg)),
            pl.BlockSpec((1, seq, ghd), lambda bi, qi, hg: (2, bi, hg)),
        ],
        out_specs=(
            pl.BlockSpec((tq, ghd), lambda bi, qi, hg: (bi * n_tq + qi, hg)),
            pl.BlockSpec((1, tq, seq), lambda bi, qi, hg: (bi, qi, 0)),
        ),
        compiler_params=pltpu.CompilerParams(
            dimension_semantics=("parallel", "parallel", "arbitrary"),
            vmem_limit_bytes=vmem_limit),
    )(qkv3, qkv3, qkv3)


# ----------------------------------------------------------------------------
# Module wrapper (parameters + forward glue)
# ----------------------------------------------------------------------------
def xavier_uniform(key, shape, gain):
    fan_out, fan_in = shape
    bound = gain * math.sqrt(6.0 / (fan_in + fan_out))
    return jax.random.uniform(key, shape, jnp.float32, -bound, bound)


def init_msa_params(key, embed_dim, num_heads, d_tilde=1):
    ks = jax.random.split(key, 8)
    g_qkv = 1.0 / math.sqrt(2 * d_tilde)   # qkv_same_dim branch
    g_out = 1.0 / math.sqrt(d_tilde)
    bound_b = 1.0 / math.sqrt(embed_dim)
    params = {
        "Wq": xavier_uniform(ks[0], (embed_dim, embed_dim), g_qkv),
        "Wk": xavier_uniform(ks[1], (embed_dim, embed_dim), g_qkv),
        "Wv": xavier_uniform(ks[2], (embed_dim, embed_dim), g_qkv),
        "Wo": xavier_uniform(ks[3], (embed_dim, embed_dim), g_out),
        # k_proj has bias=k_bias=False in the module -> zero bias.
        "bq": jax.random.uniform(ks[4], (embed_dim,), jnp.float32, -bound_b, bound_b),
        "bk": jnp.zeros((embed_dim,), jnp.float32),
        "bv": jax.random.uniform(ks[5], (embed_dim,), jnp.float32, -bound_b, bound_b),
        "bo": jnp.zeros((embed_dim,), jnp.float32),  # out_proj bias init to 0.0
    }
    return params


@functools.partial(jax.jit, static_argnames=("num_heads", "d_tilde"))
def msa_multihead_attention(query, params, num_heads, d_tilde=1):
    """query: (tgt_len, bsz, embed_dim).  Returns (attn, attn_weights_mean)."""
    t, b, e = query.shape
    h = num_heads
    assert e % h == 0
    hd = e // h
    scaling = (hd / d_tilde) ** 0.5 / hd

    # --- parameter prep (trace-time, weight-sized ops only) ------------------
    # Fold the softmax scaling into Wq/bq, stack Q/K/V into one (3, E, E)
    # weight (pre-transposed to (E_in, E_out)), cast MXU operands to bf16.
    wq = params["Wq"] * scaling
    bq = params["bq"] * scaling
    w_qkv = jnp.stack([wq.T, params["Wk"].T, params["Wv"].T]).astype(jnp.bfloat16)
    b_qkv = jnp.stack([bq, params["bk"], params["bv"]])           # (3, E) f32
    w_o = params["Wo"].T.astype(jnp.bfloat16)[None]               # (1, E, E)
    b_o = params["bo"][None]                                      # (1, E)

    # --- batch-major activations: row r = b*T + t (one cheap E-wide transpose)
    x2d = query.transpose(1, 0, 2).reshape(b * t, e).astype(jnp.bfloat16)

    # --- fused QKV projection: one GEMM, output already split into q/k/v slabs
    qkv3 = matmul_bias(x2d, w_qkv, b_qkv, out_dtype=jnp.bfloat16)  # (3, B*T, E)

    # --- attention core (reads/writes the batch-major layout directly) -------
    ctx, attn_weights = attention_core(qkv3, num_heads=h, bsz=b, seq=t)

    # --- output projection: ctx rows feed straight in, no relayout -----------
    out = matmul_bias(ctx, w_o, b_o, out_dtype=jnp.float32)[0]     # (B*T, E)
    out = out.reshape(b, t, e).transpose(1, 0, 2)                  # (T, B, E)

    # need_weights=True, need_head_weights=False -> (B, T, T) head-mean.
    return out, attn_weights


def reference_forward(query, params, num_heads, d_tilde=1):
    """Plain-JAX f32 reference replicating the torch forward (sanity check)."""
    t, b, e = query.shape
    hd = e // num_heads
    scaling = (hd / d_tilde) ** 0.5 / hd
    x = query.reshape(t * b, e)
    q = (x @ params["Wq"].T + params["bq"]) * scaling
    k = x @ params["Wk"].T + params["bk"]
    v = x @ params["Wv"].T + params["bv"]
    q = q.reshape(t, b * num_heads, hd).transpose(1, 0, 2)
    k = k.reshape(t, b * num_heads, hd).transpose(1, 0, 2)
    v = v.reshape(t, b * num_heads, hd).transpose(1, 0, 2)
    s = jnp.einsum("bqd,bkd->bqk", q, k)
    w = jax.nn.softmax(s, axis=-1)
    a = jnp.einsum("bqk,bkd->bqd", w, v)
    a = a.transpose(1, 0, 2).reshape(t, b, e)
    out = a @ params["Wo"].T + params["bo"]
    wm = w.reshape(b, num_heads, t, t).mean(axis=1)
    return out, wm


if __name__ == "__main__":
    # Small, module-consistent shapes: seq=8, batch=2, embed=32, heads=4.
    T, B, E, H = 8, 2, 32, 4
    key = jax.random.PRNGKey(0)
    k_param, k_x = jax.random.split(key)
    params = init_msa_params(k_param, E, H)
    query = jax.random.normal(k_x, (T, B, E), jnp.float32)

    out, attn_w = msa_multihead_attention(query, params, num_heads=H)
    out = jax.block_until_ready(out)
    attn_w = jax.block_until_ready(attn_w)

    # Sanity check against pure-JAX f32 reference (kernel uses bf16 MXU inputs
    # with f32 accumulation + approx reciprocal -> loosened tolerances).
    ref_out, ref_w = reference_forward(query, params, H)
    assert out.shape == (T, B, E)
    assert attn_w.shape == (B, T, T)
    assert float(jnp.max(jnp.abs(out - ref_out))) < 5e-2
    assert float(jnp.max(jnp.abs(attn_w - ref_w))) < 2e-2

    print("KERNEL_OK")
</pallas_src>

<mosaic_0001>
module attributes {stable_mosaic.version = 11 : i64} {
  func.func @_matmul_bias_kernel(%arg0: i32, %arg1: i32, %arg2: i32, %arg3: i32, %arg4: memref<16x32xbf16, #tpu.memory_space<vmem>>, %arg5: memref<1x32x32xbf16, #tpu.memory_space<vmem>>, %arg6: memref<1x1x32xf32, #tpu.memory_space<vmem>>, %arg7: memref<1x16x32xbf16, #tpu.memory_space<vmem>>, %arg8: memref<16x32xf32, #tpu.memory_space<vmem>>) attributes {dimension_semantics = [#tpu.dimension_semantics<parallel>, #tpu.dimension_semantics<parallel>, #tpu.dimension_semantics<parallel>, #tpu.dimension_semantics<arbitrary>], iteration_bounds = array<i64: 3, 1, 1, 1>, scalar_prefetch = 0 : i64, scratch_operands = 1 : i64, tpu.core_type = #tpu.core_type<tc>, window_params = [{transform_indices = @transform_0, window_bounds = array<i64: 16, 32>}, {transform_indices = @transform_1, window_bounds = array<i64: 1, 32, 32>}, {transform_indices = @transform_2, window_bounds = array<i64: 1, 1, 32>}, {transform_indices = @transform_3, window_bounds = array<i64: 1, 16, 32>}]} {
    %c0_i32 = arith.constant 0 : i32
    %0 = arith.cmpi eq, %arg3, %c0_i32 : i32
    %1 = arith.extui %0 : i1 to i32
    %c0_i32_0 = arith.constant 0 : i32
    %2 = arith.cmpi ne, %1, %c0_i32_0 : i32
    scf.if %2 {
      %cst_11 = arith.constant 0.000000e+00 : f32
      %13 = vector.broadcast %cst_11 : f32 to vector<16x32xf32>
      %c0_12 = arith.constant 0 : index
      %c0_13 = arith.constant 0 : index
      %14 = vector.load %arg8[%c0_12, %c0_13] : memref<16x32xf32, #tpu.memory_space<vmem>>, vector<16x32xf32>
      tpu.vector_store %arg8[%c0_12, %c0_13], %13 {strides = array<i32>} : memref<16x32xf32, #tpu.memory_space<vmem>>, vector<16x32xf32>,
    } else {
    }
    %c0 = arith.constant 0 : index
    %c0_1 = arith.constant 0 : index
    %3 = vector.load %arg8[%c0, %c0_1] : memref<16x32xf32, #tpu.memory_space<vmem>>, vector<16x32xf32>
    %c0_2 = arith.constant 0 : index
    %c0_3 = arith.constant 0 : index
    %4 = vector.load %arg4[%c0_2, %c0_3] : memref<16x32xbf16, #tpu.memory_space<vmem>>, vector<16x32xbf16>
    %c0_4 = arith.constant 0 : index
    %c0_5 = arith.constant 0 : index
    %c0_6 = arith.constant 0 : index
    %5 = vector.load %arg5[%c0_4, %c0_5, %c0_6] : memref<1x32x32xbf16, #tpu.memory_space<vmem>>, vector<1x32x32xbf16>
    %6 = vector.shape_cast %5 : vector<1x32x32xbf16> to vector<32x32xbf16>
    %cst = arith.constant dense<0.000000e+00> : vector<16x32xf32>
    %7 = tpu.matmul %4, %6, %cst {dimension_numbers = #tpu.dot_dimension_numbers<[1], [0], [0], [1], [0, 0, 1, 1], [], []>} : vector<16x32xbf16>, vector<32x32xbf16>, vector<16x32xf32> -> vector<16x32xf32>
    %8 = arith.addf %3, %7 : vector<16x32xf32>
    %c0_7 = arith.constant 0 : index
    %c0_8 = arith.constant 0 : index
    %9 = vector.load %arg8[%c0_7, %c0_8] : memref<16x32xf32, #tpu.memory_space<vmem>>, vector<16x32xf32>
    tpu.vector_store %arg8[%c0_7, %c0_8], %8 {strides = array<i32>} : memref<16x32xf32, #tpu.memory_space<vmem>>, vector<16x32xf32>,
    %c0_i32_9 = arith.constant 0 : i32
    %10 = arith.cmpi eq, %arg3, %c0_i32_9 : i32
    %11 = arith.extui %10 : i1 to i32
    %c0_i32_10 = arith.constant 0 : i32
    %12 = arith.cmpi ne, %11, %c0_i32_10 : i32
    scf.if %12 {
      %c0_11 = arith.constant 0 : index
      %c0_12 = arith.constant 0 : index
      %13 = vector.load %arg8[%c0_11, %c0_12] : memref<16x32xf32, #tpu.memory_space<vmem>>, vector<16x32xf32>
      %c0_13 = arith.constant 0 : index
      %c0_14 = arith.constant 0 : index
      %c0_15 = arith.constant 0 : index
      %14 = vector.load %arg6[%c0_13, %c0_14, %c0_15] : memref<1x1x32xf32, #tpu.memory_space<vmem>>, vector<1x1x32xf32>
      %15 = vector.shape_cast %14 : vector<1x1x32xf32> to vector<1x32xf32>
      %16 = vector.broadcast %15 : vector<1x32xf32> to vector<16x32xf32>
      %17 = arith.addf %13, %16 : vector<16x32xf32>
      %18 = arith.truncf %17 : vector<16x32xf32> to vector<16x32xbf16>
      %c0_16 = arith.constant 0 : index
      %c0_17 = arith.constant 0 : index
      %c0_18 = arith.constant 0 : index
      %19 = vector.load %arg7[%c0_16, %c0_17, %c0_18] : memref<1x16x32xbf16, #tpu.memory_space<vmem>>, vector<1x16x32xbf16>
      %20 = vector.shape_cast %19 : vector<1x16x32xbf16> to vector<16x32xbf16>
      %21 = vector.shape_cast %18 : vector<16x32xbf16> to vector<1x16x32xbf16>
      tpu.vector_store %arg7[%c0_16, %c0_17, %c0_18], %21 {strides = array<i32>} : memref<1x16x32xbf16, #tpu.memory_space<vmem>>, vector<1x16x32xbf16>,
    } else {
    }
    return
  }
  func.func @transform_0(%arg0: i32, %arg1: i32, %arg2: i32, %arg3: i32) -> (i32, i32) {
    %c0_i32 = arith.constant 0 : i32
    return %arg1, %arg3 : i32, i32
  }
  func.func @transform_1(%arg0: i32, %arg1: i32, %arg2: i32, %arg3: i32) -> (i32, i32, i32) {
    %c0_i32 = arith.constant 0 : i32
    return %arg0, %arg3, %arg2 : i32, i32, i32
  }
  func.func @transform_2(%arg0: i32, %arg1: i32, %arg2: i32, %arg3: i32) -> (i32, i32, i32) {
    %c0_i32 = arith.constant 0 : i32
    %c0_i32_0 = arith.constant 0 : i32
    return %arg0, %c0_i32, %arg2 : i32, i32, i32
  }
  func.func @transform_3(%arg0: i32, %arg1: i32, %arg2: i32, %arg3: i32) -> (i32, i32, i32) {
    %c0_i32 = arith.constant 0 : i32
    return %arg0, %arg1, %arg2 : i32, i32, i32
  }
}

module attributes {stable_mosaic.version = 11 : i64} {
  func.func @_attn_kernel(%arg0: i32, %arg1: i32, %arg2: i32, %arg3: memref<1x8x32xbf16, #tpu.memory_space<vmem>>, %arg4: memref<1x8x32xbf16, #tpu.memory_space<vmem>>, %arg5: memref<1x8x32xbf16, #tpu.memory_space<vmem>>, %arg6: memref<8x32xbf16, #tpu.memory_space<vmem>>, %arg7: memref<1x8x8xf32, #tpu.memory_space<vmem>>) attributes {dimension_semantics = [#tpu.dimension_semantics<parallel>, #tpu.dimension_semantics<parallel>, #tpu.dimension_semantics<arbitrary>], iteration_bounds = array<i64: 2, 1, 1>, scalar_prefetch = 0 : i64, scratch_operands = 0 : i64, tpu.core_type = #tpu.core_type<tc>, window_params = [{transform_indices = @transform_0, window_bounds = array<i64: 1, 8, 32>}, {transform_indices = @transform_1, window_bounds = array<i64: 1, 8, 32>}, {transform_indices = @transform_2, window_bounds = array<i64: 1, 8, 32>}, {transform_indices = @transform_3, window_bounds = array<i64: 8, 32>}, {transform_indices = @transform_4, window_bounds = array<i64: 1, 8, 8>}]} {
    %c0 = arith.constant 0 : index
    %c0_0 = arith.constant 0 : index
    %c0_1 = arith.constant 0 : index
    %0 = vector.load %arg3[%c0, %c0_0, %c0_1] : memref<1x8x32xbf16, #tpu.memory_space<vmem>>, vector<1x8x32xbf16>
    %1 = vector.shape_cast %0 : vector<1x8x32xbf16> to vector<8x32xbf16>
    %c0_2 = arith.constant 0 : index
    %c0_3 = arith.constant 0 : index
    %c0_4 = arith.constant 0 : index
    %2 = vector.load %arg4[%c0_2, %c0_3, %c0_4] : memref<1x8x32xbf16, #tpu.memory_space<vmem>>, vector<1x8x32xbf16>
    %3 = vector.shape_cast %2 : vector<1x8x32xbf16> to vector<8x32xbf16>
    %c0_5 = arith.constant 0 : index
    %c0_6 = arith.constant 0 : index
    %c0_7 = arith.constant 0 : index
    %4 = vector.load %arg5[%c0_5, %c0_6, %c0_7] : memref<1x8x32xbf16, #tpu.memory_space<vmem>>, vector<1x8x32xbf16>
    %5 = vector.shape_cast %4 : vector<1x8x32xbf16> to vector<8x32xbf16>
    %6 = vector.extract_strided_slice %1 {offsets = [0, 0], sizes = [8, 8], strides = [1, 1]} : vector<8x32xbf16> to vector<8x8xbf16>
    %7 = vector.extract_strided_slice %3 {offsets = [0, 0], sizes = [8, 8], strides = [1, 1]} : vector<8x32xbf16> to vector<8x8xbf16>
    %8 = vector.extract_strided_slice %5 {offsets = [0, 0], sizes = [8, 8], strides = [1, 1]} : vector<8x32xbf16> to vector<8x8xbf16>
    "tpu.trace_start"() <{level = 10 : i32, message = "td,sd->ts"}> : () -> ()
    %cst = arith.constant dense<0.000000e+00> : vector<8x8xf32>
    %9 = tpu.matmul %6, %7, %cst {dimension_numbers = #tpu.dot_dimension_numbers<[1], [1], [0], [0], [0, 0, 1, 0], [], []>} : vector<8x8xbf16>, vector<8x8xbf16>, vector<8x8xf32> -> vector<8x8xf32>
    "tpu.trace_stop"() : () -> ()
    %cst_8 = arith.constant dense<0xFF800000> : vector<8xf32>
    %10 = vector.multi_reduction <maximumf>, %9, %cst_8 [1] : vector<8x8xf32> to vector<8xf32>
    %11 = vector.shape_cast %10 : vector<8xf32> to vector<8x1xf32>
    %12 = vector.broadcast %11 : vector<8x1xf32> to vector<8x8xf32>
    %13 = arith.subf %9, %12 : vector<8x8xf32>
    %14 = math.exp %13 : vector<8x8xf32>
    %cst_9 = arith.constant dense<0.000000e+00> : vector<8xf32>
    %15 = vector.multi_reduction <add>, %14, %cst_9 [1] : vector<8x8xf32> to vector<8xf32>
    %16 = vector.shape_cast %15 : vector<8xf32> to vector<8x1xf32>
    %17 = tpu.reciprocal %16 {approx = true} : vector<8x1xf32> -> vector<8x1xf32>
    %18 = vector.broadcast %17 : vector<8x1xf32> to vector<8x8xf32>
    %19 = arith.mulf %14, %18 : vector<8x8xf32>
    %20 = arith.truncf %19 : vector<8x8xf32> to vector<8x8xbf16>
    %cst_10 = arith.constant dense<0.000000e+00> : vector<8x8xf32>
    %21 = tpu.matmul %20, %8, %cst_10 {dimension_numbers = #tpu.dot_dimension_numbers<[1], [0], [0], [1], [0, 0, 1, 1], [], []>} : vector<8x8xbf16>, vector<8x8xbf16>, vector<8x8xf32> -> vector<8x8xf32>
    %22 = arith.truncf %21 : vector<8x8xf32> to vector<8x8xbf16>
    %23 = vector.extract_strided_slice %1 {offsets = [0, 8], sizes = [8, 8], strides = [1, 1]} : vector<8x32xbf16> to vector<8x8xbf16>
    %24 = vector.extract_strided_slice %3 {offsets = [0, 8], sizes = [8, 8], strides = [1, 1]} : vector<8x32xbf16> to vector<8x8xbf16>
    %25 = vector.extract_strided_slice %5 {offsets = [0, 8], sizes = [8, 8], strides = [1, 1]} : vector<8x32xbf16> to vector<8x8xbf16>
    "tpu.trace_start"() <{level = 10 : i32, message = "td,sd->ts"}> : () -> ()
    %cst_11 = arith.constant dense<0.000000e+00> : vector<8x8xf32>
    %26 = tpu.matmul %23, %24, %cst_11 {dimension_numbers = #tpu.dot_dimension_numbers<[1], [1], [0], [0], [0, 0, 1, 0], [], []>} : vector<8x8xbf16>, vector<8x8xbf16>, vector<8x8xf32> -> vector<8x8xf32>
    "tpu.trace_stop"() : () -> ()
    %cst_12 = arith.constant dense<0xFF800000> : vector<8xf32>
    %27 = vector.multi_reduction <maximumf>, %26, %cst_12 [1] : vector<8x8xf32> to vector<8xf32>
    %28 = vector.shape_cast %27 : vector<8xf32> to vector<8x1xf32>
    %29 = vector.broadcast %28 : vector<8x1xf32> to vector<8x8xf32>
    %30 = arith.subf %26, %29 : vector<8x8xf32>
    %31 = math.exp %30 : vector<8x8xf32>
    %cst_13 = arith.constant dense<0.000000e+00> : vector<8xf32>
    %32 = vector.multi_reduction <add>, %31, %cst_13 [1] : vector<8x8xf32> to vector<8xf32>
    %33 = vector.shape_cast %32 : vector<8xf32> to vector<8x1xf32>
    %34 = tpu.reciprocal %33 {approx = true} : vector<8x1xf32> -> vector<8x1xf32>
    %35 = vector.broadcast %34 : vector<8x1xf32> to vector<8x8xf32>
    %36 = arith.mulf %31, %35 : vector<8x8xf32>
    %37 = arith.truncf %36 : vector<8x8xf32> to vector<8x8xbf16>
    %cst_14 = arith.constant dense<0.000000e+00> : vector<8x8xf32>
    %38 = tpu.matmul %37, %25, %cst_14 {dimension_numbers = #tpu.dot_dimension_numbers<[1], [0], [0], [1], [0, 0, 1, 1], [], []>} : vector<8x8xbf16>, vector<8x8xbf16>, vector<8x8xf32> -> vector<8x8xf32>
    %39 = arith.truncf %38 : vector<8x8xf32> to vector<8x8xbf16>
    %40 = arith.addf %19, %36 : vector<8x8xf32>
    %41 = vector.extract_strided_slice %1 {offsets = [0, 16], sizes = [8, 8], strides = [1, 1]} : vector<8x32xbf16> to vector<8x8xbf16>
    %42 = vector.extract_strided_slice %3 {offsets = [0, 16], sizes = [8, 8], strides = [1, 1]} : vector<8x32xbf16> to vector<8x8xbf16>
    %43 = vector.extract_strided_slice %5 {offsets = [0, 16], sizes = [8, 8], strides = [1, 1]} : vector<8x32xbf16> to vector<8x8xbf16>
    "tpu.trace_start"() <{level = 10 : i32, message = "td,sd->ts"}> : () -> ()
    %cst_15 = arith.constant dense<0.000000e+00> : vector<8x8xf32>
    %44 = tpu.matmul %41, %42, %cst_15 {dimension_numbers = #tpu.dot_dimension_numbers<[1], [1], [0], [0], [0, 0, 1, 0], [], []>} : vector<8x8xbf16>, vector<8x8xbf16>, vector<8x8xf32> -> vector<8x8xf32>
    "tpu.trace_stop"() : () -> ()
    %cst_16 = arith.constant dense<0xFF800000> : vector<8xf32>
    %45 = vector.multi_reduction <maximumf>, %44, %cst_16 [1] : vector<8x8xf32> to vector<8xf32>
    %46 = vector.shape_cast %45 : vector<8xf32> to vector<8x1xf32>
    %47 = vector.broadcast %46 : vector<8x1xf32> to vector<8x8xf32>
    %48 = arith.subf %44, %47 : vector<8x8xf32>
    %49 = math.exp %48 : vector<8x8xf32>
    %cst_17 = arith.constant dense<0.000000e+00> : vector<8xf32>
    %50 = vector.multi_reduction <add>, %49, %cst_17 [1] : vector<8x8xf32> to vector<8xf32>
    %51 = vector.shape_cast %50 : vector<8xf32> to vector<8x1xf32>
    %52 = tpu.reciprocal %51 {approx = true} : vector<8x1xf32> -> vector<8x1xf32>
    %53 = vector.broadcast %52 : vector<8x1xf32> to vector<8x8xf32>
    %54 = arith.mulf %49, %53 : vector<8x8xf32>
    %55 = arith.truncf %54 : vector<8x8xf32> to vector<8x8xbf16>
    %cst_18 = arith.constant dense<0.000000e+00> : vector<8x8xf32>
    %56 = tpu.matmul %55, %43, %cst_18 {dimension_numbers = #tpu.dot_dimension_numbers<[1], [0], [0], [1], [0, 0, 1, 1], [], []>} : vector<8x8xbf16>, vector<8x8xbf16>, vector<8x8xf32> -> vector<8x8xf32>
    %57 = arith.truncf %56 : vector<8x8xf32> to vector<8x8xbf16>
    %58 = arith.addf %40, %54 : vector<8x8xf32>
    %59 = vector.extract_strided_slice %1 {offsets = [0, 24], sizes = [8, 8], strides = [1, 1]} : vector<8x32xbf16> to vector<8x8xbf16>
    %60 = vector.extract_strided_slice %3 {offsets = [0, 24], sizes = [8, 8], strides = [1, 1]} : vector<8x32xbf16> to vector<8x8xbf16>
    %61 = vector.extract_strided_slice %5 {offsets = [0, 24], sizes = [8, 8], strides = [1, 1]} : vector<8x32xbf16> to vector<8x8xbf16>
    "tpu.trace_start"() <{level = 10 : i32, message = "td,sd->ts"}> : () -> ()
    %cst_19 = arith.constant dense<0.000000e+00> : vector<8x8xf32>
    %62 = tpu.matmul %59, %60, %cst_19 {dimension_numbers = #tpu.dot_dimension_numbers<[1], [1], [0], [0], [0, 0, 1, 0], [], []>} : vector<8x8xbf16>, vector<8x8xbf16>, vector<8x8xf32> -> vector<8x8xf32>
    "tpu.trace_stop"() : () -> ()
    %cst_20 = arith.constant dense<0xFF800000> : vector<8xf32>
    %63 = vector.multi_reduction <maximumf>, %62, %cst_20 [1] : vector<8x8xf32> to vector<8xf32>
    %64 = vector.shape_cast %63 : vector<8xf32> to vector<8x1xf32>
    %65 = vector.broadcast %64 : vector<8x1xf32> to vector<8x8xf32>
    %66 = arith.subf %62, %65 : vector<8x8xf32>
    %67 = math.exp %66 : vector<8x8xf32>
    %cst_21 = arith.constant dense<0.000000e+00> : vector<8xf32>
    %68 = vector.multi_reduction <add>, %67, %cst_21 [1] : vector<8x8xf32> to vector<8xf32>
    %69 = vector.shape_cast %68 : vector<8xf32> to vector<8x1xf32>
    %70 = tpu.reciprocal %69 {approx = true} : vector<8x1xf32> -> vector<8x1xf32>
    %71 = vector.broadcast %70 : vector<8x1xf32> to vector<8x8xf32>
    %72 = arith.mulf %67, %71 : vector<8x8xf32>
    %73 = arith.truncf %72 : vector<8x8xf32> to vector<8x8xbf16>
    %cst_22 = arith.constant dense<0.000000e+00> : vector<8x8xf32>
    %74 = tpu.matmul %73, %61, %cst_22 {dimension_numbers = #tpu.dot_dimension_numbers<[1], [0], [0], [1], [0, 0, 1, 1], [], []>} : vector<8x8xbf16>, vector<8x8xbf16>, vector<8x8xf32> -> vector<8x8xf32>
    %75 = arith.truncf %74 : vector<8x8xf32> to vector<8x8xbf16>
    %76 = arith.addf %58, %72 : vector<8x8xf32>
    %77 = tpu.concatenate %22, %39, %57, %75 in 1 : vector<8x8xbf16>, vector<8x8xbf16>, vector<8x8xbf16>, vector<8x8xbf16> -> vector<8x32xbf16>
    %c0_23 = arith.constant 0 : index
    %c0_24 = arith.constant 0 : index
    %78 = vector.load %arg6[%c0_23, %c0_24] : memref<8x32xbf16, #tpu.memory_space<vmem>>, vector<8x32xbf16>
    tpu.vector_store %arg6[%c0_23, %c0_24], %77 {strides = array<i32>} : memref<8x32xbf16, #tpu.memory_space<vmem>>, vector<8x32xbf16>,
    %c0_i32 = arith.constant 0 : i32
    %79 = arith.cmpi eq, %arg2, %c0_i32 : i32
    %80 = arith.extui %79 : i1 to i32
    %c0_i32_25 = arith.constant 0 : i32
    %81 = arith.cmpi ne, %80, %c0_i32_25 : i32
    scf.if %81 {
      %cst_33 = arith.constant 0.000000e+00 : f32
      %90 = vector.broadcast %cst_33 : f32 to vector<1x8x8xf32>
      %c0_34 = arith.constant 0 : index
      %c0_35 = arith.constant 0 : index
      %c0_36 = arith.constant 0 : index
      %91 = vector.load %arg7[%c0_34, %c0_35, %c0_36] : memref<1x8x8xf32, #tpu.memory_space<vmem>>, vector<1x8x8xf32>
      tpu.vector_store %arg7[%c0_34, %c0_35, %c0_36], %90 {strides = array<i32>} : memref<1x8x8xf32, #tpu.memory_space<vmem>>, vector<1x8x8xf32>,
    } else {
    }
    %c0_26 = arith.constant 0 : index
    %c0_27 = arith.constant 0 : index
    %c0_28 = arith.constant 0 : index
    %82 = vector.load %arg7[%c0_26, %c0_27, %c0_28] : memref<1x8x8xf32, #tpu.memory_space<vmem>>, vector<1x8x8xf32>
    %83 = vector.shape_cast %82 : vector<1x8x8xf32> to vector<8x8xf32>
    %cst_29 = arith.constant 2.500000e-01 : f32
    %84 = vector.broadcast %cst_29 : f32 to vector<8x8xf32>
    %85 = arith.mulf %76, %84 : vector<8x8xf32>
    %86 = arith.addf %83, %85 : vector<8x8xf32>
    %c0_30 = arith.constant 0 : index
    %c0_31 = arith.constant 0 : index
    %c0_32 = arith.constant 0 : index
    %87 = vector.load %arg7[%c0_30, %c0_31, %c0_32] : memref<1x8x8xf32, #tpu.memory_space<vmem>>, vector<1x8x8xf32>
    %88 = vector.shape_cast %87 : vector<1x8x8xf32> to vector<8x8xf32>
    %89 = vector.shape_cast %86 : vector<8x8xf32> to vector<1x8x8xf32>
    tpu.vector_store %arg7[%c0_30, %c0_31, %c0_32], %89 {strides = array<i32>} : memref<1x8x8xf32, #tpu.memory_space<vmem>>, vector<1x8x8xf32>,
    return
  }
  func.func @transform_0(%arg0: i32, %arg1: i32, %arg2: i32) -> (i32, i32, i32) {
    %c1_i32 = arith.constant 1 : i32
    %0 = arith.muli %arg0, %c1_i32 : i32
    %1 = arith.addi %0, %arg1 : i32
    %c0_i32 = arith.constant 0 : i32
    %c0_i32_0 = arith.constant 0 : i32
    return %c0_i32, %1, %arg2 : i32, i32, i32
  }
  func.func @transform_1(%arg0: i32, %arg1: i32, %arg2: i32) -> (i32, i32, i32) {
    %c1_i32 = arith.constant 1 : i32
    %c0_i32 = arith.constant 0 : i32
    return %c1_i32, %arg0, %arg2 : i32, i32, i32
  }
  func.func @transform_2(%arg0: i32, %arg1: i32, %arg2: i32) -> (i32, i32, i32) {
    %c2_i32 = arith.constant 2 : i32
    %c0_i32 = arith.constant 0 : i32
    return %c2_i32, %arg0, %arg2 : i32, i32, i32
  }
  func.func @transform_3(%arg0: i32, %arg1: i32, %arg2: i32) -> (i32, i32) {
    %c1_i32 = arith.constant 1 : i32
    %0 = arith.muli %arg0, %c1_i32 : i32
    %1 = arith.addi %0, %arg1 : i32
    %c0_i32 = arith.constant 0 : i32
    return %1, %arg2 : i32, i32
  }
  func.func @transform_4(%arg0: i32, %arg1: i32, %arg2: i32) -> (i32, i32, i32) {
    %c0_i32 = arith.constant 0 : i32
    %c0_i32_0 = arith.constant 0 : i32
    return %arg0, %arg1, %c0_i32 : i32, i32, i32
  }
}

module attributes {stable_mosaic.version = 11 : i64} {
  func.func @_matmul_bias_kernel(%arg0: i32, %arg1: i32, %arg2: i32, %arg3: i32, %arg4: memref<16x32xbf16, #tpu.memory_space<vmem>>, %arg5: memref<1x32x32xbf16, #tpu.memory_space<vmem>>, %arg6: memref<1x1x32xf32, #tpu.memory_space<vmem>>, %arg7: memref<1x16x32xf32, #tpu.memory_space<vmem>>, %arg8: memref<16x32xf32, #tpu.memory_space<vmem>>) attributes {dimension_semantics = [#tpu.dimension_semantics<parallel>, #tpu.dimension_semantics<parallel>, #tpu.dimension_semantics<parallel>, #tpu.dimension_semantics<arbitrary>], iteration_bounds = array<i64: 1, 1, 1, 1>, scalar_prefetch = 0 : i64, scratch_operands = 1 : i64, tpu.core_type = #tpu.core_type<tc>, window_params = [{transform_indices = @transform_0, window_bounds = array<i64: 16, 32>}, {transform_indices = @transform_1, window_bounds = array<i64: 1, 32, 32>}, {transform_indices = @transform_2, window_bounds = array<i64: 1, 1, 32>}, {transform_indices = @transform_3, window_bounds = array<i64: 1, 16, 32>}]} {
    %c0_i32 = arith.constant 0 : i32
    %0 = arith.cmpi eq, %arg3, %c0_i32 : i32
    %1 = arith.extui %0 : i1 to i32
    %c0_i32_0 = arith.constant 0 : i32
    %2 = arith.cmpi ne, %1, %c0_i32_0 : i32
    scf.if %2 {
      %cst_11 = arith.constant 0.000000e+00 : f32
      %13 = vector.broadcast %cst_11 : f32 to vector<16x32xf32>
      %c0_12 = arith.constant 0 : index
      %c0_13 = arith.constant 0 : index
      %14 = vector.load %arg8[%c0_12, %c0_13] : memref<16x32xf32, #tpu.memory_space<vmem>>, vector<16x32xf32>
      tpu.vector_store %arg8[%c0_12, %c0_13], %13 {strides = array<i32>} : memref<16x32xf32, #tpu.memory_space<vmem>>, vector<16x32xf32>,
    } else {
    }
    %c0 = arith.constant 0 : index
    %c0_1 = arith.constant 0 : index
    %3 = vector.load %arg8[%c0, %c0_1] : memref<16x32xf32, #tpu.memory_space<vmem>>, vector<16x32xf32>
    %c0_2 = arith.constant 0 : index
    %c0_3 = arith.constant 0 : index
    %4 = vector.load %arg4[%c0_2, %c0_3] : memref<16x32xbf16, #tpu.memory_space<vmem>>, vector<16x32xbf16>
    %c0_4 = arith.constant 0 : index
    %c0_5 = arith.constant 0 : index
    %c0_6 = arith.constant 0 : index
    %5 = vector.load %arg5[%c0_4, %c0_5, %c0_6] : memref<1x32x32xbf16, #tpu.memory_space<vmem>>, vector<1x32x32xbf16>
    %6 = vector.shape_cast %5 : vector<1x32x32xbf16> to vector<32x32xbf16>
    %cst = arith.constant dense<0.000000e+00> : vector<16x32xf32>
    %7 = tpu.matmul %4, %6, %cst {dimension_numbers = #tpu.dot_dimension_numbers<[1], [0], [0], [1], [0, 0, 1, 1], [], []>} : vector<16x32xbf16>, vector<32x32xbf16>, vector<16x32xf32> -> vector<16x32xf32>
    %8 = arith.addf %3, %7 : vector<16x32xf32>
    %c0_7 = arith.constant 0 : index
    %c0_8 = arith.constant 0 : index
    %9 = vector.load %arg8[%c0_7, %c0_8] : memref<16x32xf32, #tpu.memory_space<vmem>>, vector<16x32xf32>
    tpu.vector_store %arg8[%c0_7, %c0_8], %8 {strides = array<i32>} : memref<16x32xf32, #tpu.memory_space<vmem>>, vector<16x32xf32>,
    %c0_i32_9 = arith.constant 0 : i32
    %10 = arith.cmpi eq, %arg3, %c0_i32_9 : i32
    %11 = arith.extui %10 : i1 to i32
    %c0_i32_10 = arith.constant 0 : i32
    %12 = arith.cmpi ne, %11, %c0_i32_10 : i32
    scf.if %12 {
      %c0_11 = arith.constant 0 : index
      %c0_12 = arith.constant 0 : index
      %13 = vector.load %arg8[%c0_11, %c0_12] : memref<16x32xf32, #tpu.memory_space<vmem>>, vector<16x32xf32>
      %c0_13 = arith.constant 0 : index
      %c0_14 = arith.constant 0 : index
      %c0_15 = arith.constant 0 : index
      %14 = vector.load %arg6[%c0_13, %c0_14, %c0_15] : memref<1x1x32xf32, #tpu.memory_space<vmem>>, vector<1x1x32xf32>
      %15 = vector.shape_cast %14 : vector<1x1x32xf32> to vector<1x32xf32>
      %16 = vector.broadcast %15 : vector<1x32xf32> to vector<16x32xf32>
      %17 = arith.addf %13, %16 : vector<16x32xf32>
      %c0_16 = arith.constant 0 : index
      %c0_17 = arith.constant 0 : index
      %c0_18 = arith.constant 0 : index
      %18 = vector.load %arg7[%c0_16, %c0_17, %c0_18] : memref<1x16x32xf32, #tpu.memory_space<vmem>>, vector<1x16x32xf32>
      %19 = vector.shape_cast %18 : vector<1x16x32xf32> to vector<16x32xf32>
      %20 = vector.shape_cast %17 : vector<16x32xf32> to vector<1x16x32xf32>
      tpu.vector_store %arg7[%c0_16, %c0_17, %c0_18], %20 {strides = array<i32>} : memref<1x16x32xf32, #tpu.memory_space<vmem>>, vector<1x16x32xf32>,
    } else {
    }
    return
  }
  func.func @transform_0(%arg0: i32, %arg1: i32, %arg2: i32, %arg3: i32) -> (i32, i32) {
    %c0_i32 = arith.constant 0 : i32
    return %arg1, %arg3 : i32, i32
  }
  func.func @transform_1(%arg0: i32, %arg1: i32, %arg2: i32, %arg3: i32) -> (i32, i32, i32) {
    %c0_i32 = arith.constant 0 : i32
    return %arg0, %arg3, %arg2 : i32, i32, i32
  }
  func.func @transform_2(%arg0: i32, %arg1: i32, %arg2: i32, %arg3: i32) -> (i32, i32, i32) {
    %c0_i32 = arith.constant 0 : i32
    %c0_i32_0 = arith.constant 0 : i32
    return %arg0, %c0_i32, %arg2 : i32, i32, i32
  }
  func.func @transform_3(%arg0: i32, %arg1: i32, %arg2: i32, %arg3: i32) -> (i32, i32, i32) {
    %c0_i32 = arith.constant 0 : i32
    return %arg0, %arg1, %arg2 : i32, i32, i32
  }
}

</mosaic_0001>

<bundles_post_ra>
// kernel: msa_multihead_attention.5
= control target key start
LH: loop header
LB: loop body
LE: loop exit
PB: predicated region body
PF: predicated region fallthrough
CT: control target
= control target key end

     0   :  { %vm19_vm0 = vcmask 261120   ;;  %v137_v0 = vmov 0.0   ;;  %vm138_vm1 = vmmov 0   ;;  %s184_s1 = inlined_call_operand.vmem [shape: bf16[1,32,32], index: 1, kind: input, shape index: {}]   ;;  %s185_s0 = inlined_call_operand.vmem [shape: bf16[16,32], index: 0, kind: input, shape index: {}]   ;;  %s186_s2 = inlined_call_operand.vmem [shape: f32[1,1,32], index: 2, kind: input, shape index: {}]   ;;  %s187_s3 = inlined_call_operand.vmem [shape: f32[1,16,32], index: 3, kind: output, shape index: {}]  }
   0x1   :  { %124 = vmatprep.subr.bf16.mxu0 %v137_v0  ;;  %v134_v1 = vld [vmem:[%s184_s1 + $0x8] sm:$0xff]   ;;  %128 = vmatprep.mubr.msk.bf16.mxu0 %vm138_vm1, %v137_v0  ;;  %20 = vst.msk [vmem:[#allocation2] sm:$0xff] %vm19_vm0, %v137_v0  ;;  %21 = vst.msk [vmem:[#allocation2 + $0x8] sm:$0xff] %vm19_vm0, %v137_v0  ;;  %v135_v2 = vld [vmem:[%s184_s1] sm:$0xff]  }
   0x2   :  { %125 = vmatpush3.bf16.msra.mxu0 %v134_v1  ;;  %v136_v3 = vld [vmem:[%s185_s0] sm:$0xff]  }
   0x3   :  { %126 = vmatprep.subr.bf16.mxu0 %v137_v0  ;;  %v120_v12 = vld [vmem:[%s186_s2] ss:$0 sm:$0xff] }
   0x6   :  { %127 = vmatpush3.bf16.msra.mxu0 %v135_v2 }
   0x8   :  { %v22_v4 = vld [vmem:[#allocation2] sm:$0xff]  ;;  %v23_v8 = vld [vmem:[#allocation2 + $0x8] sm:$0xff] }
   0x9   :  { %129 = vmatmul.mubr.msk.bf16.vlgmr.msra.gmra.mxu0 %vm19_vm0, %v136_v3 }
  0xc9   :  { %v85_v5 = vpop.f32.mrf.mxu0 }
  0xca   :  { %v92_v6 = vadd.f32 %v85_v5, %v22_v4 }
  0xcb   :  { %v130_v7 = vpop.f32.mrf.mxu0 }
  0xcc   :  { %94 = vst.msk [vmem:[#allocation2] sm:$0xff] %vm19_vm0, %v92_v6 }
  0xcd   :  { %v88_v9 = vpop.f32.mrf.mxu0 }
  0xce   :  { %v93_v10 = vadd.f32 %v88_v9, %v23_v8 }
  0xcf   :  { %v131_v11 = vpop.f32.mrf.mxu0 }
  0xd0   :  { %95 = vst.msk [vmem:[#allocation2 + $0x8] sm:$0xff] %vm19_vm0, %v93_v10 }
  0xd3   :  { %v99_v13 = vld [vmem:[#allocation2] sm:$0xff] }
  0xd4   :  { %v108_v14 = vadd.f32 %v120_v12, %v99_v13 }
  0xd6   :  { %110 = vst.msk [vmem:[%s187_s3] sm:$0xff] %vm19_vm0, %v108_v14 }
  0xd7   :  { %v100_v15 = vld [vmem:[#allocation2 + $0x8] sm:$0xff] }
  0xd8   :  { %v109_v16 = vadd.f32 %v120_v12, %v100_v15 }
  0xda   :  { %111 = vst.msk [vmem:[%s187_s3 + $0x8] sm:$0xff] %vm19_vm0, %v109_v16 }

// kernel: msa_multihead_attention.3
= control target key start
LH: loop header
LB: loop body
LE: loop exit
PB: predicated region body
PF: predicated region fallthrough
CT: control target
= control target key end

     0   :  { %s653_s12 = smov 0   ;;  %s655_s13 = smov 0   ;;  %s697_s0 = inlined_call_operand.vmem [shape: bf16[16,32], index: 0, kind: input, shape index: {}]   ;;  %s698_s1 = inlined_call_operand.vmem [shape: bf16[3,32,32], index: 1, kind: input, shape index: {}]   ;;  %s699_s2 = inlined_call_operand.vmem [shape: f32[3,1,32], index: 2, kind: input, shape index: {}]   ;;  %s700_s3 = inlined_call_operand.vmem [shape: bf16[3,16,32], index: 3, kind: output, shape index: {}]  }
   0x1   :  { %s657_s14 = smov 0  }
   0x2 LB: > { %s39_s15 = sadd.s32 1, %s625_s13  ;;  %p549_p0 = scmp.ge.s32.totalorder %s629_s14, 1  ;;  %s629_s14 = sphi %s657_s14, %s13_s14   ;;  %s625_s13 = sphi %s655_s13, %s702_s13   ;;  %s621_s12 = sphi %s653_s12, %s701_s12  }
   0x3   : > { %p41_p1 = scmp.ge.s32.totalorder %s39_s15, 3  ;;  %p208_p2 = scmp.lt.s32.totalorder %s629_s14, 4 }
   0x5   : > { %s704_s15 = smov (%p41_p1, %s39_s15), 0  ;;  %p209_p3 = pnand %p549_p0, %p208_p2 }
   0x6   : > { %p270_p4 = scmp.lt.s32.totalorder (!%p209_p3), %s621_s12, 2 }
   0x7   : > { %212 = sbr.rel (%p209_p3) target bundleno = 235 (0xeb), region = 32 }
   0xc   : > { %vm306_vm0 = vcmask 261120   ;;  %v631_v0 = vmov 0.0   ;;  %vm632_vm1 = vmmov 0   ;;  %s706_s12 = smov (!%p270_p4, %s621_s12), 2  ;;  %v606_v3 = vld [vmem:[%s697_s0] sm:$0xff]   ;;  %vm405_vm2 = vcmask 257024  }
   0xd   : > { %570 = vmatprep.subr.bf16.mxu0 %v631_v0  ;;  %574 = vmatprep.mubr.msk.bf16.mxu0 %vm632_vm1, %v631_v0  ;;  %307 = vst.msk [vmem:[#allocation2] sm:$0xff] %vm306_vm0, %v631_v0  ;;  %308 = vst.msk [vmem:[#allocation2 + $0x8] sm:$0xff] %vm306_vm0, %v631_v0  ;;  %s563_s16 = sshll.u32 %s706_s12, 4  ;;  %s287_s24 = scalar_lea.vmem %s699_s2, %s706_s12 }
   0xe   : > { %s280_s19 = scalar_lea.vmem %s698_s1, %s563_s16  ;;  %v558_v12 = vld [vmem:[%s287_s24] ss:$0 sm:$0xff]  ;;  %s564_s25 = sshll.u32 %s706_s12, 3 }
   0xf   : > { %v604_v1 = vld [vmem:[%s280_s19 + $0x8] sm:$0xff]   ;;  %v605_v2 = vld [vmem:[%s280_s19] sm:$0xff]   ;;  %s299_s28 = scalar_lea.vmem %s700_s3, %s564_s25 }
  0x10   : > { %571 = vmatpush3.bf16.msra.mxu0 %v604_v1 }
  0x11   : > { %572 = vmatprep.subr.bf16.mxu0 %v631_v0 }
  0x14   : > { %573 = vmatpush3.bf16.msra.mxu0 %v605_v2  ;;  %v309_v4 = vld [vmem:[#allocation2] sm:$0xff]  ;;  %v310_v8 = vld [vmem:[#allocation2 + $0x8] sm:$0xff] }
  0x17   : > { %575 = vmatmul.mubr.msk.bf16.vlgmr.msra.gmra.mxu0 %vm306_vm0, %v606_v3 }
  0xd7   : > { %v372_v5 = vpop.f32.mrf.mxu0 }
  0xd8   : > { %v379_v6 = vadd.f32 %v372_v5, %v309_v4 }
  0xd9   : > { %v576_v7 = vpop.f32.mrf.mxu0 }
  0xda   : > { %381 = vst.msk [vmem:[#allocation2] sm:$0xff] %vm306_vm0, %v379_v6 }
  0xdb   : > { %v375_v9 = vpop.f32.mrf.mxu0 }
  0xdc   : > { %v380_v10 = vadd.f32 %v375_v9, %v310_v8 }
  0xdd   : > { %v577_v11 = vpop.f32.mrf.mxu0 }
  0xde   : > { %382 = vst.msk [vmem:[#allocation2 + $0x8] sm:$0xff] %vm306_vm0, %v380_v10 }
  0xe1   : > { %v386_v13 = vld [vmem:[#allocation2] sm:$0xff] }
  0xe2   : > { %v395_v14 = vadd.f32 %v558_v12, %v386_v13 }
  0xe4   : > { %v565_v15 = vpack.c.bf16 %v395_v14, %v395_v14 }
  0xe5   : > { %v387_v16 = vld [vmem:[#allocation2 + $0x8] sm:$0xff] }
  0xe6   : > { %406 = vst.msk [vmem:[%s299_s28] sm:$0xf] %vm405_vm2, %v565_v15  ;;  %v396_v17 = vadd.f32 %v558_v12, %v387_v16 }
  0xe8   : > { %v566_v18 = vpack.c.bf16 %v396_v17, %v396_v17 }
  0xea   : > { %407 = vst.msk [vmem:[%s299_s28 + $0x4] sm:$0xf] %vm405_vm2, %v566_v18 }
  0xeb PF: > { %s13_s14 = sadd.s32 1, %s629_s14   ;;  %s701_s12 = smov %s625_s13 }
  0xec   : > { %p10_p5 = scmp.ge.s32.totalorder %s13_s14, 5   ;;  %s702_s13 = smov %s704_s15 }
  0xee   :  { %12 = sbr.rel (!%p10_p5) target bundleno = 2 (0x2), region = 76 }

// kernel: msa_multihead_attention.4
= control target key start
LH: loop header
LB: loop body
LE: loop exit
PB: predicated region body
PF: predicated region fallthrough
CT: control target
= control target key end

     0   :  { %10 = vsyncpa [#allocation3], 0  ;;  %s1457_s0 = inlined_call_operand.vmem [shape: bf16[3,16,32], index: 0, kind: input, shape index: {}, may-alias: {0,1,2}]   ;;  %s1458_s1 = inlined_call_operand.vmem [shape: bf16[3,16,32], index: 1, kind: input, shape index: {}, may-alias: {0,1,2}]   ;;  %s1459_s2 = inlined_call_operand.vmem [shape: bf16[3,16,32], index: 2, kind: input, shape index: {}, may-alias: {0,1,2}]   ;;  %s1460_s3 = inlined_call_operand.vmem [shape: bf16[16,32], index: 3, kind: output, shape index: {0}]   ;;  %s1461_s4 = inlined_call_operand.hbm [shape: f32[2,8,8], index: 4, kind: output, shape index: {1}]  }
   0x1   :  { %12 = vsyncpa [#allocation3 + $0x1], 0  ;;  %s1258_s15 = smov 0   ;;  %s1260_s16 = smov 0  }
   0x2   :  { %s1262_s17 = smov 0   ;;  %s1264_s18 = smov 0  }
   0x3   :  { %s1266_s19 = smov 0   ;;  %s1268_s20 = smov 0  }
   0x4 LB: > { %s973_s21 = sadd.s32 4294967295, %s1222_s20   ;;  %s974_s22 = sadd.s32 4294967294, %s1222_s20   ;;  %s1222_s20 = sphi %s1268_s20, %s18_s20   ;;  %s1218_s19 = sphi %s1266_s19, %s1468_s19   ;;  %s1214_s18 = sphi %s1264_s18, %s1467_s18   ;;  %s1210_s17 = sphi %s1262_s17, %s1466_s17   ;;  %s1206_s16 = sphi %s1260_s16, %s1465_s16   ;;  %s1202_s15 = sphi %s1258_s15, %s1464_s15  }
   0x5   : > { %s37_s23 = sadd.s32 1, %s1218_s19  ;;  %s162_s24 = sadd.s32 1, %s1210_s17 }
   0x6   : > { %p39_p0 = scmp.ge.s32.totalorder %s37_s23, 2  ;;  %p172_p1 = scmp.ne.s32.totalorder %s1210_s17, %s1206_s16 }
   0x7   : > { %p173_p2 = scmp.eq.s32.totalorder %s973_s21, 1  ;;  %p178_p3 = scmp.ne.s32.totalorder %s1206_s16, %s1202_s15 }
   0x8   : > { %s1470_s23 = smov (%p39_p0, %s37_s23), 0  ;;  %p179_p5 = scmp.eq.s32.totalorder %s974_s22, 1 }
   0x9   : > { %p1298_p4 = por %p173_p2, %p172_p1  ;;  %s157_s26 = ssub.s32 %s1218_s19, %s1470_s23 }
   0xa   : > { %p977_p6 = scmp.ge.s32.totalorder %s1222_s20, 1  ;;  %p160_p7 = scmp.eq.s32.totalorder %s157_s26, 0 }
   0xb   : > { %p1305_p8 = por %p179_p5, %p178_p3  ;;  %p231_p9 = scmp.lt.s32.totalorder %s1222_s20, 3 }
   0xc   : > { %s1311_s28 = scalar_select %p160_p7, %s1210_s17, %s162_s24  }
   0xd   : > { %p232_p10 = pnand %p977_p6, %p231_p9 }
   0xe   : > { %p285_p11 = scmp.lt.s32.totalorder (!%p232_p10), %s1214_s18, 1  ;;  %s1226_s11 = smov (!%p232_p10), 120  }
   0xf   : > { %235 = sbr.rel (%p232_p10) target bundleno = 1420 (0x58c), region = 32  ;;  %s1227_s12 = smov (!%p232_p10), 112  }
  0x10   : > { %s1228_s13 = smov (!%p232_p10), 104   ;;  %s281_s24 = sand.u32 (!%p232_p10), 1, %s1206_s16  }
  0x11   : > { %s978_s26 = sshll.u32 (!%p232_p10), %s281_s24, 3  ;;  %s1229_s5 = smov (!%p232_p10), 8  }
  0x12   : > { %s1230_s6 = smov (!%p232_p10), 16   ;;  %s1231_s14 = smov (!%p232_p10), [#allocation2]  }
  0x13   : > { %s1150_s21 = sshll.u32 (!%p232_p10), %s1231_s14, 4  ;;  %s1151_s21 = int_to_ptr.vmem [resolvable:$false] %s1150_s21 }
  0x14   : > { %v1224_v0 = vmov 0.0   ;;  %vm1225_vm0 = vmmov 0   ;;  %s286_s29 = scalar_select %p285_p11, %s1214_s18, 1  ;;  %vm322_vm1 = vcmask 64512   ;;  %vm384_vm2 = vcmask 1043456  }
  0x15   : > { %1016 = vmatprep.subr.bf16.mxu0 %v1224_v0  ;;  %1018 = vmatprep.mubr.msk.bf16.mxu0 %vm1225_vm0, %v1224_v0 }
  0x16   : > { %1022 = vmatprep.subr.bf16.mxu1 %v1224_v0  ;;  %1024 = vmatprep.mubr.msk.bf16.mxu1 %vm1225_vm0, %v1224_v0  ;;  %s1321_s30 = sshll.u32 %s286_s29, 2  ;;  %s1388_s29 = scalar_lea.vmem [#allocation2], %s978_s26 }
  0x17   : > { %s896_s7 = scalar_lea.vmem %s1458_s1, %s1321_s30  ;;  %s291_s10 = scalar_lea.vmem %s1457_s0, %s1321_s30  ;;  %799 = vst.msk [vmem:[%s1388_s29] sm:$0xff] %vm322_vm1, %v1224_v0 }
  0x18   : > { %v983_v1 = vld [vmem:[%s896_s7 + $0x8] sm:$0xf]  ;;  %v319_v3 = vld [vmem:[%s291_s10] sm:$0xf]  ;;  %s900_s22 = scalar_lea.vmem %s1459_s2, %s1321_s30  ;;  %s997_s7 = sshll.u32 %s1214_s18, 7 }
  0x19   : > { %v327_v2 = vsel %vm322_vm1, %v983_v1, 0  ;;  %v988_v9 = vcombine.low %v983_v1, %v983_v1  ;;  %v987_v10 = vcombine.low %v319_v3, %v319_v3  ;;  %v1347_v16 = vld [vmem:[%s900_s22 + $0x10] sm:$0xf]  ;;  %s831_s8 = sshll.u32 %s1388_s29, 4  ;;  %s1152_s22 = scalar_lea.vmem %s1151_s21, 256  ;;  %s832_s8 = int_to_ptr.vmem [resolvable:$true] %s831_s8 }
  0x1a   : > { %1017 = vmatpush3.bf16.xpose.msra.mxu0 %v327_v2  ;;  %v386_v17 = vsel %vm384_vm2, %v1347_v16, 0  ;;  %v990_v60 = vcombine.low %v1347_v16, %v1347_v16  ;;  %p1153_p1 = scmp.lt.s32.totalorder %s832_s8, %s1151_s21 }
  0x1b   : > { %1034 = vmatprep.subr.bf16.mxu0 %v1224_v0  ;;  %437 = vrot.lane.b32.xlu1 %v988_v9, %s1226_s11 }
  0x1c   : > { %1023 = vmatpush3.bf16.msra.mxu1 %v386_v17 }
  0x1d   : > { %1028 = vmatprep.subr.bf16.mxu1 %v1224_v0 }
  0x1f   : > { %432 = vrot.lane.b32.xlu1 %v987_v10, %s1226_s11 }
  0x21   : > { %1019 = vmatmul.mubr.msk.bf16.vlgmr.msra.gmra.mxu0 %vm322_vm1, %v319_v3 }
  0x22   : > { %1036 = vmatprep.mubr.msk.bf16.mxu0 %vm1225_vm0, %v1224_v0 }
  0x23   : > { %550 = vrot.lane.b32.xlu1 %v987_v10, %s1227_s12 }
  0x27   : > { %664 = vrot.lane.b32.xlu1 %v988_v9, %s1228_s13 }
  0x2b   : > { %662 = vrot.lane.b32.xlu1 %v987_v10, %s1228_s13 }
  0x8d   : > { %v438_v20 = vpop.permute.xlu1 %437 }
  0x8e   : > { %v443_v22 = vsel %vm322_vm1, %v438_v20, 0 }
  0x91   : > { %v433_v24 = vpop.permute.xlu1 %432 }
  0x95   : > { %v551_v26 = vpop.permute.xlu1 %550 }
  0x99   : > { %v665_v28 = vpop.permute.xlu1 %664 }
  0x9a   : > { %v670_v29 = vsel %vm322_vm1, %v665_v28, 0 }
  0x9d   : > { %v663_v30 = vpop.permute.xlu1 %662 }
  0xe1   : > { %v363_v4 = vpop.f32.mrf.mxu0 }
  0xe2   : > { %v369_v5 = vsel %vm322_vm1, %v363_v4, -inf }
  0xe3   : > { %370 = vmax.xlane.f32.xlu0 %v369_v5  ;;  %v1020_v6 = vpop.f32.mrf.mxu0 }
  0xe5   : > { %v366_v7 = vpop.f32.mrf.mxu0 }
  0xe7   : > { %v1021_v8 = vpop.f32.mrf.mxu0 }
 0x16c   : > { %v371_v11 = vpop.xlane.xlu0 %370 }
 0x16d   : > { %v372_v12 = vsub.f32 %v363_v4, %v371_v11 }
 0x16f   : > { %v373_v13 = vmul.f32 1.442695, %v372_v12 }
 0x171   : > { %1130 = vpow2.f32 %v373_v13 }
 0x17e   : > { %v1131_v14 = vpop.eup %1130 }
 0x17f   : > { %v375_v15 = vsel %vm322_vm1, %v1131_v14, 0.0 }
 0x180   : > { %376 = vadd.xlane.f32.xlu0 %v375_v15 }
 0x196   : > { %552 = vrot.lane.b32.xlu0 %v988_v9, %s1227_s12 }
 0x209   : > { %v377_v18 = vpop.xlane.xlu0 %376 }
 0x20a   : > { %1132 = vrcp.f32 %v377_v18 }
 0x20d   : > { %v553_v25 = vpop.permute.xlu0 %552 }
 0x20e   : > { %v558_v27 = vsel %vm322_vm1, %v553_v25, 0  ;;  %v800_v25 = vld [vmem:[%s1388_s29] sm:$0xff] }
 0x217   : > { %v1133_v19 = vpop.eup %1132 }
 0x218   : > { %v1353_v21 = vmul.f32 %v1133_v19, %v1131_v14 }
 0x21a   : > { %v380_v23 = vpack.c.bf16 %v1353_v21, %v1353_v21 }
 0x21c   : > { %1025 = vmatmul.mubr.msk.bf16.vlgmr.msra.gmra.mxu1 %vm322_vm1, %v380_v23 }
 0x21d   : > { %1029 = vmatpush3.bf16.xpose.msra.mxu1 %v443_v22  ;;  %1030 = vmatprep.mubr.msk.bf16.mxu1 %vm1225_vm0, %v1224_v0 }
 0x21e   : > { %1040 = vmatprep.subr.bf16.mxu1 %v1224_v0 }
 0x224   : > { %1031 = vmatmul.mubr.msk.bf16.vlgmr.msra.gmra.mxu1 %vm322_vm1, %v433_v24 }
 0x225   : > { %1041 = vmatpush3.bf16.xpose.msra.mxu1 %v558_v27  ;;  %1042 = vmatprep.mubr.msk.bf16.mxu1 %vm1225_vm0, %v1224_v0 }
 0x226   : > { %1052 = vmatprep.subr.bf16.mxu1 %v1224_v0 }
 0x22c   : > { %1043 = vmatmul.mubr.msk.bf16.vlgmr.msra.gmra.mxu1 %vm322_vm1, %v551_v26 }
 0x22d   : > { %1053 = vmatpush3.bf16.xpose.msra.mxu1 %v670_v29  ;;  %1054 = vmatprep.mubr.msk.bf16.mxu1 %vm1225_vm0, %v1224_v0 }
 0x234   : > { %1055 = vmatmul.mubr.msk.bf16.vlgmr.msra.gmra.mxu1 %vm322_vm1, %v663_v30 }
 0x2dc   : > { %v1372_v31 = vpop.f32.mrf.mxu1 }
 0x2de   : > { %v1026_v32 = vpop.f32.mrf.mxu1 }
 0x2e0   : > { %v425_v33 = vpop.f32.mrf.mxu1 }
 0x2e2   : > { %v1027_v34 = vpop.f32.mrf.mxu1 }
 0x2e4   : > { %v479_v35 = vpop.f32.mrf.mxu1 }
 0x2e5   : > { %v485_v36 = vsel %vm322_vm1, %v479_v35, -inf }
 0x2e6   : > { %486 = vmax.xlane.f32.xlu1 %v485_v36  ;;  %v1032_v37 = vpop.f32.mrf.mxu1 }
 0x2e8   : > { %v482_v38 = vpop.f32.mrf.mxu1 }
 0x2ea   : > { %v1033_v39 = vpop.f32.mrf.mxu1 }
 0x2ec   : > { %v594_v40 = vpop.f32.mrf.mxu1 }
 0x2ed   : > { %v600_v41 = vsel %vm322_vm1, %v594_v40, -inf }
 0x2ee   : > { %601 = vmax.xlane.f32.xlu0 %v600_v41  ;;  %v1044_v42 = vpop.f32.mrf.mxu1 }
 0x2f0   : > { %v597_v43 = vpop.f32.mrf.mxu1 }
 0x2f2   : > { %v1045_v44 = vpop.f32.mrf.mxu1 }
 0x2f4   : > { %v706_v45 = vpop.f32.mrf.mxu1 }
 0x2f5   : > { %v712_v46 = vsel %vm322_vm1, %v706_v45, -inf }
 0x2f6   : > { %713 = vmax.xlane.f32.xlu1 %v712_v46  ;;  %v1056_v47 = vpop.f32.mrf.mxu1 }
 0x2f8   : > { %v709_v48 = vpop.f32.mrf.mxu1 }
 0x2fa   : > { %v1057_v49 = vpop.f32.mrf.mxu1 }
 0x36f   : > { %v487_v50 = vpop.xlane.xlu1 %486 }
 0x370   : > { %v488_v51 = vsub.f32 %v479_v35, %v487_v50 }
 0x372   : > { %v489_v52 = vmul.f32 1.442695, %v488_v51 }
 0x374   : > { %1134 = vpow2.f32 %v489_v52 }
 0x377   : > { %v602_v53 = vpop.xlane.xlu0 %601 }
 0x378   : > { %v603_v54 = vsub.f32 %v594_v40, %v602_v53 }
 0x37a   : > { %v604_v55 = vmul.f32 1.442695, %v603_v54 }
 0x37c   : > { %1136 = vpow2.f32 %v604_v55 }
 0x37f   : > { %v714_v61 = vpop.xlane.xlu1 %713 }
 0x380   : > { %v715_v62 = vsub.f32 %v706_v45, %v714_v61 }
 0x381   : > { %v1135_v56 = vpop.eup %1134 }
 0x382   : > { %v491_v57 = vsel %vm322_vm1, %v1135_v56, 0.0  ;;  %v716_v63 = vmul.f32 1.442695, %v715_v62 }
 0x383   : > { %492 = vadd.xlane.f32.xlu1 %v491_v57 }
 0x384   : > { %1138 = vpow2.f32 %v716_v63 }
 0x389   : > { %v1137_v58 = vpop.eup %1136 }
 0x38a   : > { %v606_v59 = vsel %vm322_vm1, %v1137_v58, 0.0 }
 0x38b   : > { %607 = vadd.xlane.f32.xlu0 %v606_v59 }
 0x391   : > { %v1139_v1 = vpop.eup %1138 }
 0x392   : > { %v718_v2 = vsel %vm322_vm1, %v1139_v1, 0.0 }
 0x394   : > { %612 = vrot.lane.b32.xlu1 %v990_v60, %s1227_s12  ;;  %s813_s12 = scalar_lea.sflag [#allocation3], %s281_s24 }
 0x3a1   : > { %500 = vrot.lane.b32.xlu0 %v990_v60, %s1226_s11  ;;  %s829_s11 = scalar_lea.hbm %s1461_s4, %s997_s7 }
 0x3b8   : > { %719 = vadd.xlane.f32.xlu1 %v718_v2 }
 0x3c9   : > { %724 = vrot.lane.b32.xlu1 %v990_v60, %s1228_s13  ;;  %s1146_s13 = scalar_lea.vmem %s832_s8, 128 }
 0x3ca   : > { %p1147_p12 = scmp.ne.s32.totalorder %s832_s8, %s1146_s13  ;;  %p1154_p2 = scmp.lt.s32.totalorder %s1152_s22, %s1146_s13 }
 0x3cc   : > { %p1148_p13 = pnand %p1147_p12, %p1298_p4  ;;  %p1155_p3 = por %p1154_p2, %p1153_p1 }
 0x3ce   : > { %p1149_p0 = pneg %p1148_p13 }
 0x3d0   : > { %p1156_p5 = pnand %p1155_p3, %p1149_p0 }
 0x40c   : > { %v493_v3 = vpop.xlane.xlu1 %492 }
 0x40d   : > { %1140 = vrcp.f32 %v493_v3 }
 0x410   : > { %v613_v9 = vpop.permute.xlu1 %612 }
 0x411   : > { %v618_v11 = vsel %vm384_vm2, %v613_v9, 0 }
 0x414   : > { %v608_v4 = vpop.xlane.xlu0 %607 }
 0x415   : > { %1142 = vrcp.f32 %v608_v4 }
 0x418   : > { %v501_v5 = vpop.permute.xlu0 %500 }
 0x419   : > { %v506_v6 = vsel %vm384_vm2, %v501_v5, 0 }
 0x41a   : > { %v1141_v7 = vpop.eup %1140  ;;  %1035 = vmatpush3.bf16.msra.mxu0 %v506_v6 }
 0x41b   : > { %1046 = vmatprep.subr.bf16.mxu0 %v1224_v0  ;;  %v495_v8 = vmul.f32 %v1141_v7, %v1135_v56 }
 0x41d   : > { %v496_v10 = vpack.c.bf16 %v495_v8, %v495_v8  ;;  %v549_v18 = vadd.f32 %v495_v8, %v1353_v21 }
 0x41f   : > { %1037 = vmatmul.mubr.msk.bf16.vlgmr.msra.gmra.mxu0 %vm322_vm1, %v496_v10 }
 0x420   : > { %1047 = vmatpush3.bf16.msra.mxu0 %v618_v11  ;;  %1048 = vmatprep.mubr.msk.bf16.mxu0 %vm1225_vm0, %v1224_v0 }
 0x421   : > { %1058 = vmatprep.subr.bf16.mxu0 %v1224_v0 }
 0x422   : > { %v1143_v12 = vpop.eup %1142 }
 0x423   : > { %v610_v13 = vmul.f32 %v1143_v12, %v1137_v58 }
 0x425   : > { %v611_v14 = vpack.c.bf16 %v610_v13, %v610_v13  ;;  %v661_v22 = vadd.f32 %v610_v13, %v549_v18 }
 0x427   : > { %1049 = vmatmul.mubr.msk.bf16.vlgmr.msra.gmra.mxu0 %vm322_vm1, %v611_v14 }
 0x428   : > { %1060 = vmatprep.mubr.msk.bf16.mxu0 %vm1225_vm0, %v1224_v0 }
 0x441   : > { %v720_v15 = vpop.xlane.xlu1 %719 }
 0x442   : > { %1144 = vrcp.f32 %v720_v15 }
 0x445   : > { %v725_v16 = vpop.permute.xlu1 %724 }
 0x446   : > { %v730_v17 = vsel %vm384_vm2, %v725_v16, 0 }
 0x447   : > { %1059 = vmatpush3.bf16.msra.mxu0 %v730_v17 }
 0x44f   : > { %v1145_v19 = vpop.eup %1144 }
 0x450   : > { %v722_v20 = vmul.f32 %v1145_v19, %v1139_v1 }
 0x452   : > { %v723_v23 = vpack.c.bf16 %v722_v20, %v722_v20  ;;  %v773_v24 = vadd.f32 %v722_v20, %v661_v22 }
 0x454   : > { %1061 = vmatmul.mubr.msk.bf16.vlgmr.msra.gmra.mxu0 %vm322_vm1, %v723_v23  ;;  %v801_v26 = vmul.f32 0.25, %v773_v24 }
 0x456   : > { %v802_v27 = vadd.f32 %v801_v26, %v800_v25 }
 0x458   : > { %803 = vst.msk [vmem:[%s1388_s29] sm:$0xff] %vm322_vm1, %v802_v27 }
 0x4df   : > { %v542_v0 = vpop.f32.mrf.mxu0 }
 0x4e0   : > { %v548_v28 = vpack.c.bf16 %v542_v0, %v542_v0 }
 0x4e1   : > { %v1038_v29 = vpop.f32.mrf.mxu0 }
 0x4e2   : > { %775 = vrot.lane.b32.xlu0 %v548_v28, %s1229_s5 }
 0x4e3   : > { %v545_v21 = vpop.f32.mrf.mxu0 }
 0x4e5   : > { %v1039_v30 = vpop.f32.mrf.mxu0 }
 0x4e7   : > { %v654_v32 = vpop.f32.mrf.mxu0 }
 0x4e8   : > { %v660_v33 = vpack.c.bf16 %v654_v32, %v654_v32 }
 0x4e9   : > { %v1050_v34 = vpop.f32.mrf.mxu0 }
 0x4ea   : > { %778 = vrot.lane.b32.xlu1 %v660_v33, %s1230_s6 }
 0x4eb   : > { %v657_v35 = vpop.f32.mrf.mxu0 }
 0x4ed   : > { %v1051_v36 = vpop.f32.mrf.mxu0 }
 0x4ee   : > { %1159 = shalt.err (!%p1156_p5)
}
 0x4ef   : > { %s1160_s18 = scalar_lea.hbm %s829_s11, 128  ;;  %s1164_s29 = scalar_lea.hbm %s1461_s4, 256 }
 0x4f0   : > { %p1161_p6 = scmp.ne.s32.totalorder %s829_s11, %s1160_s18  ;;  %p1165_p10 = scmp.lt.s32.totalorder %s829_s11, %s1461_s4 }
 0x4f1   : > { %p1166_p11 = scmp.lt.s32.totalorder %s1164_s29, %s1160_s18 }
 0x4f2   : > { %p1162_p7 = pnand %p1161_p6, %p1298_p4 }
 0x4f3   : > { %p1167_p12 = por %p1166_p11, %p1165_p10 }
 0x4f4   : > { %p1163_p9 = pneg %p1162_p7 }
 0x4f6   : > { %p1168_p13 = pnand %p1167_p12, %p1163_p9 }
 0x4f8   : > { %1171 = shalt.err (!%p1168_p13)
}
 0x4f9   : > { %1064 = dma.vmem_to_hbm [thread:$0]  (%p1298_p4), %s832_s8, 128, %s829_s11, %s813_s12   ;;  %v428_v43 = vpack.c.bf16 %v1372_v31, %v1372_v31  ;;  %vm786_vm3 = vcmask 130048   ;;  %vm789_vm4 = vcmask 195584   ;;  %vm793_vm5 = vcmask 257024  }
 0x4fa   : > { %s1232_s7 = smov 24   ;;  %s316_s8 = scalar_lea.vmem %s1460_s3, %s1321_s30 }
 0x514   : > { %v766_v37 = vpop.f32.mrf.mxu0 }
 0x515   : > { %v772_v38 = vpack.c.bf16 %v766_v37, %v766_v37 }
 0x516   : > { %v1062_v39 = vpop.f32.mrf.mxu0 }
 0x517   : > { %781 = vrot.lane.b32.xlu0 %v772_v38, %s1232_s7 }
 0x518   : > { %v769_v40 = vpop.f32.mrf.mxu0 }
 0x51a   : > { %v1063_v41 = vpop.f32.mrf.mxu0 }
 0x554   : > { %v776_v42 = vpop.permute.xlu0 %775 }
 0x555   : > { %v785_v45 = vsel %vm322_vm1, %v428_v43, %v776_v42 }
 0x55c   : > { %v779_v44 = vpop.permute.xlu1 %778 }
 0x55d   : > { %v788_v46 = vsel %vm786_vm3, %v785_v45, %v779_v44 }
 0x589   : > { %v782_v47 = vpop.permute.xlu0 %781 }
 0x58a   : > { %v791_v48 = vsel %vm789_vm4, %v788_v46, %v782_v47 }
 0x58b   : > { %794 = vst.msk [vmem:[%s316_s8] sm:$0xf] %vm793_vm5, %v791_v48 }
 0x58c PF: > { %p1070_p4 = scmp.ge.s32.totalorder %s1222_s20, 2  ;;  %s854_s10 = sand.u32 1, %s1202_s15  }
 0x58d   : > { %s855_s11 = scalar_lea.sflag [#allocation3], %s854_s10 }
 0x58e   : > { %p1067_p0 = pnand %p1070_p4, %p1305_p8 }
 0x590   : > { %p1068_p1 = pneg %p1067_p0 }
 0x592   : > { %1197 = dma.done.wait (%p1068_p1), %s855_s11, 128  }
 0x593   : > { %1199 = vsyncadd (%p1068_p1), %s855_s11, 4294967168  ;;  %s18_s20 = sadd.s32 1, %s1222_s20   ;;  %s1464_s15 = smov %s1206_s16 }
 0x594   : > { %p15_p2 = scmp.ge.s32.totalorder %s18_s20, 4   ;;  %s1465_s16 = smov %s1210_s17 }
 0x595   : > { %s1466_s17 = smov %s1311_s28  ;;  %s1467_s18 = smov %s1218_s19 }
 0x596   : > { %s1468_s19 = smov %s1470_s23  ;;  %17 = sbr.rel (!%p15_p2) target bundleno = 4 (0x4), region = 89 }
 0x59b   :  { %860 = vsyncpa [#allocation3], 1 }
 0x59c   :  { %862 = vsyncpa [#allocation3 + $0x1], 1 }

</bundles_post_ra>
